<compile_context>
chip_gen: v7x
topology: tpu7x:2x2x1
jax: 0.10.0
libtpu: 0.0.40
codegen_flags: <defaults>
</compile_context>

<pallas_src>
import jax
import jax.numpy as jnp
from jax.experimental import pallas as pl
from jax.experimental.pallas import tpu as pltpu


def segmentation_pinn_kernel(x_ref, w1t_ref, b1_ref, w2t_ref, b2_ref,
                             wht_ref, pt_ref, out_ref):
    """One lane-tile of points (feature-major: features on sublanes, points on lanes).

      x_ref   : (IN, tn)    f32   input points, transposed
      w1t_ref : (H1, IN)    f32   W1^T
      b1_ref  : (H1, 1)     f32
      w2t_ref : (H2, H1)    f32   W2^T
      b2_ref  : (H2, 1)     f32
      wht_ref : (Cpad, H2)  f32   Wh^T, class dim zero-padded to a sublane multiple
      pt_ref  : (P, C)      f32   problem_parameters^T
      out_ref : (P, tn)     f32   K^T
    """
    x = x_ref[...]                              # (IN, tn), lane-dense
    w1t = w1t_ref[...]                          # (H1, IN)
    pt = pt_ref[...]                            # (P, C)
    in_features = w1t.shape[1]
    num_classes = pt.shape[1]                   # true C (wht rows may be padded)

    # --- hidden layer 1: K = in_features (tiny) -> VPU outer-product FMAs ---
    h = w1t[:, 0:1] * x[0:1, :]
    for k in range(1, in_features):             # static unroll over IN (=2)
        h = h + w1t[:, k:k + 1] * x[k:k + 1, :]
    h = jnp.maximum(h + b1_ref[...], 0.0)       # (H1, tn); (H1,1) bias lane-bcast

    # --- hidden layer 2: (H2,H1) @ (H1,tn) on the MXU, f32 operands/accum ---
    h = jnp.dot(w2t_ref[...], h, preferred_element_type=jnp.float32)
    h = jnp.maximum(h + b2_ref[...], 0.0)       # (H2, tn)

    # --- classification head (no bias): (Cpad,H2) @ (H2,tn) -----------------
    logits = jnp.dot(wht_ref[...], h, preferred_element_type=jnp.float32)

    # --- softmax over the (small) class axis via explicit dense row ops -----
    rows = [logits[c:c + 1, :] for c in range(num_classes)]     # (1, tn) each
    m = rows[0]
    for r in rows[1:]:
        m = jnp.maximum(m, r)
    es = [jnp.exp(r - m) for r in rows]
    denom = es[0]
    for e in es[1:]:
        denom = denom + e
    inv = pl.reciprocal(denom, approx=False)    # exact 1/x (PINN-grade numerics)

    # --- K^T (P, tn) = params^T (P,C) @ softmax(logits): C VPU FMAs ---------
    acc = pt[:, 0:1] * es[0]
    for c in range(1, num_classes):
        acc = acc + pt[:, c:c + 1] * es[c]
    out_ref[...] = (acc * inv).astype(out_ref.dtype)


def _choose_lane_tile(n):
    """Points (lanes) per grid step: lane-dense, <= 8192, >= 2 steps when possible."""
    max_tn = 8192
    n_blocks = max(pl.cdiv(n, 128), 1)          # 128-lane blocks needed
    if n_blocks * 128 <= max_tn:
        # Small problems: aim for exactly 2 grid steps (v7x has 2 TensorCores).
        return 128 * max(pl.cdiv(n_blocks, 2), 1)
    return max_tn


def segmentation_pinn_forward(x, w1, b1, w2, b2, wh, problem_parameters, *, tn=None):
    """SegmentationPINN forward.  x: (N, input_size) -> K: (N, param_dim), f32."""
    N, in_features = x.shape
    H1 = w1.shape[1]
    H2 = w2.shape[1]
    C, P = problem_parameters.shape

    if tn is None:
        tn = _choose_lane_tile(N)
    assert tn % 128 == 0
    grid = max(pl.cdiv(N, tn), 1)
    if grid > 1 and grid % 2 == 1:              # balance v7x's two TensorCores
        grid += 1
    n_pad = grid * tn

    # Feature-major (transposed) operands: points map to TPU lanes.
    x_t = jnp.asarray(x, jnp.float32).T                          # (IN, N)
    if n_pad != N:
        x_t = jnp.pad(x_t, ((0, 0), (0, n_pad - N)))

    w1_t = jnp.asarray(w1, jnp.float32).T                        # (H1, IN)
    b1_c = jnp.asarray(b1, jnp.float32).reshape(H1, 1)
    w2_t = jnp.asarray(w2, jnp.float32).T                        # (H2, H1)
    b2_c = jnp.asarray(b2, jnp.float32).reshape(H2, 1)
    # Pad Wh^T's class dim up to a sublane multiple (extra rows are zero and
    # never read downstream — the kernel uses only the first C logits rows).
    c_pad = max(8, pl.cdiv(C, 8) * 8)
    wh_t = jnp.zeros((c_pad, H2), jnp.float32).at[:C, :].set(
        jnp.asarray(wh, jnp.float32).T)
    params_t = jnp.asarray(problem_parameters, jnp.float32).T    # (P, C)

    def resident(arr):
        return pl.BlockSpec(arr.shape, lambda i: (0, 0))

    k_t = pl.pallas_call(
        segmentation_pinn_kernel,
        out_shape=jax.ShapeDtypeStruct((P, n_pad), jnp.float32),
        grid_spec=pl.GridSpec(
            grid=(grid,),
            in_specs=[
                pl.BlockSpec((in_features, tn), lambda i: (0, i)),   # x tile
                resident(w1_t),                  # W1^T   (H1, IN)
                resident(b1_c),                  # b1     (H1, 1)
                resident(w2_t),                  # W2^T   (H2, H1)
                resident(b2_c),                  # b2     (H2, 1)
                resident(wh_t),                  # Wh^T   (Cpad, H2)
                resident(params_t),              # params^T (P, C)
            ],
            out_specs=pl.BlockSpec((P, tn), lambda i: (0, i)),
        ),
        compiler_params=pltpu.CompilerParams(
            dimension_semantics=("parallel",)),
    )(x_t, w1_t, b1_c, w2_t, b2_c, wh_t, params_t)

    return k_t[:, :N].T                                           # (N, P)


def reference_forward(x, w1, b1, w2, b2, wh, params):
    h = jnp.maximum(x @ w1 + b1, 0.0)
    h = jnp.maximum(h @ w2 + b2, 0.0)
    logits = h @ wh
    p = jax.nn.softmax(logits, axis=-1)
    return p @ params


if __name__ == "__main__":
    # Shapes implied by the module: input (t, x) point -> input_size=2,
    # hidden_layers=[32, 32], problem_parameters: (num_classes=4, param_dim=3).
    key = jax.random.PRNGKey(0)
    ks = jax.random.split(key, 8)

    N = 256            # number of input points (collocation batch)
    input_size = 2
    H1, H2 = 32, 32
    num_classes = 4
    param_dim = 3

    x = jax.random.normal(ks[0], (N, input_size), dtype=jnp.float32)

    # Deterministic parameter init (Kaiming-ish uniform, like nn.Linear defaults).
    def linear_init(kw, kb, fan_in, fan_out):
        bound = 1.0 / jnp.sqrt(fan_in)
        w = jax.random.uniform(kw, (fan_in, fan_out), jnp.float32, -bound, bound)
        b = jax.random.uniform(kb, (fan_out,), jnp.float32, -bound, bound)
        return w, b

    w1, b1 = linear_init(ks[1], ks[2], input_size, H1)
    w2, b2 = linear_init(ks[3], ks[4], H1, H2)
    wh, _ = linear_init(ks[5], ks[6], H2, num_classes)   # head has no bias
    problem_parameters = jax.random.normal(ks[7], (num_classes, param_dim),
                                           dtype=jnp.float32)

    K = segmentation_pinn_forward(x, w1, b1, w2, b2, wh, problem_parameters)
    K = jax.block_until_ready(K)

    K_ref = reference_forward(x, w1, b1, w2, b2, wh, problem_parameters)
    assert K.shape == (N, param_dim)
    # f32 matmuls + exact reciprocal -> tight tolerance vs the f32 reference.
    assert jnp.allclose(K, K_ref, atol=1e-4, rtol=1e-4), float(
        jnp.max(jnp.abs(K - K_ref)))

    print("KERNEL_OK")
</pallas_src>

<mosaic_0001>
module attributes {stable_mosaic.version = 11 : i64} {
  func.func @segmentation_pinn_kernel(%arg0: i32, %arg1: memref<2x128xf32, #tpu.memory_space<vmem>>, %arg2: memref<32x2xf32, #tpu.memory_space<vmem>>, %arg3: memref<32x1xf32, #tpu.memory_space<vmem>>, %arg4: memref<32x32xf32, #tpu.memory_space<vmem>>, %arg5: memref<32x1xf32, #tpu.memory_space<vmem>>, %arg6: memref<8x32xf32, #tpu.memory_space<vmem>>, %arg7: memref<3x4xf32, #tpu.memory_space<vmem>>, %arg8: memref<3x128xf32, #tpu.memory_space<vmem>>) attributes {dimension_semantics = [#tpu.dimension_semantics<parallel>], iteration_bounds = array<i64: 2>, scalar_prefetch = 0 : i64, scratch_operands = 0 : i64, tpu.core_type = #tpu.core_type<tc>, window_params = [{transform_indices = @transform_0, window_bounds = array<i64: 2, 128>}, {pipeline_mode = #tpu.pipeline_mode<synchronous>, transform_indices = @transform_1, window_bounds = array<i64: 32, 2>}, {pipeline_mode = #tpu.pipeline_mode<synchronous>, transform_indices = @transform_2, window_bounds = array<i64: 32, 1>}, {pipeline_mode = #tpu.pipeline_mode<synchronous>, transform_indices = @transform_3, window_bounds = array<i64: 32, 32>}, {pipeline_mode = #tpu.pipeline_mode<synchronous>, transform_indices = @transform_4, window_bounds = array<i64: 32, 1>}, {pipeline_mode = #tpu.pipeline_mode<synchronous>, transform_indices = @transform_5, window_bounds = array<i64: 8, 32>}, {pipeline_mode = #tpu.pipeline_mode<synchronous>, transform_indices = @transform_6, window_bounds = array<i64: 3, 4>}, {transform_indices = @transform_7, window_bounds = array<i64: 3, 128>}]} {
    %c0 = arith.constant 0 : index
    %c0_0 = arith.constant 0 : index
    %0 = vector.load %arg1[%c0, %c0_0] : memref<2x128xf32, #tpu.memory_space<vmem>>, vector<2x128xf32>
    %c0_1 = arith.constant 0 : index
    %c0_2 = arith.constant 0 : index
    %1 = vector.load %arg2[%c0_1, %c0_2] : memref<32x2xf32, #tpu.memory_space<vmem>>, vector<32x2xf32>
    %c0_3 = arith.constant 0 : index
    %c0_4 = arith.constant 0 : index
    %2 = vector.load %arg7[%c0_3, %c0_4] : memref<3x4xf32, #tpu.memory_space<vmem>>, vector<3x4xf32>
    %3 = vector.extract_strided_slice %1 {offsets = [0, 0], sizes = [32, 1], strides = [1, 1]} : vector<32x2xf32> to vector<32x1xf32>
    %4 = vector.extract_strided_slice %0 {offsets = [0, 0], sizes = [1, 128], strides = [1, 1]} : vector<2x128xf32> to vector<1x128xf32>
    %5 = vector.broadcast %3 : vector<32x1xf32> to vector<32x128xf32>
    %6 = vector.broadcast %4 : vector<1x128xf32> to vector<32x128xf32>
    %7 = arith.mulf %5, %6 : vector<32x128xf32>
    %8 = vector.extract_strided_slice %1 {offsets = [0, 1], sizes = [32, 1], strides = [1, 1]} : vector<32x2xf32> to vector<32x1xf32>
    %9 = vector.extract_strided_slice %0 {offsets = [1, 0], sizes = [1, 128], strides = [1, 1]} : vector<2x128xf32> to vector<1x128xf32>
    %10 = vector.broadcast %8 : vector<32x1xf32> to vector<32x128xf32>
    %11 = vector.broadcast %9 : vector<1x128xf32> to vector<32x128xf32>
    %12 = arith.mulf %10, %11 : vector<32x128xf32>
    %13 = arith.addf %7, %12 : vector<32x128xf32>
    %c0_5 = arith.constant 0 : index
    %c0_6 = arith.constant 0 : index
    %14 = vector.load %arg3[%c0_5, %c0_6] : memref<32x1xf32, #tpu.memory_space<vmem>>, vector<32x1xf32>
    %15 = vector.broadcast %14 : vector<32x1xf32> to vector<32x128xf32>
    %16 = arith.addf %13, %15 : vector<32x128xf32>
    %cst = arith.constant 0.000000e+00 : f32
    %17 = vector.broadcast %cst : f32 to vector<32x128xf32>
    %18 = arith.maximumf %16, %17 : vector<32x128xf32>
    %c0_7 = arith.constant 0 : index
    %c0_8 = arith.constant 0 : index
    %19 = vector.load %arg4[%c0_7, %c0_8] : memref<32x32xf32, #tpu.memory_space<vmem>>, vector<32x32xf32>
    %cst_9 = arith.constant dense<0.000000e+00> : vector<32x128xf32>
    %20 = tpu.matmul %19, %18, %cst_9 {dimension_numbers = #tpu.dot_dimension_numbers<[1], [0], [0], [1], [0, 0, 1, 1], [], []>} : vector<32x32xf32>, vector<32x128xf32>, vector<32x128xf32> -> vector<32x128xf32>
    %c0_10 = arith.constant 0 : index
    %c0_11 = arith.constant 0 : index
    %21 = vector.load %arg5[%c0_10, %c0_11] : memref<32x1xf32, #tpu.memory_space<vmem>>, vector<32x1xf32>
    %22 = vector.broadcast %21 : vector<32x1xf32> to vector<32x128xf32>
    %23 = arith.addf %20, %22 : vector<32x128xf32>
    %cst_12 = arith.constant 0.000000e+00 : f32
    %24 = vector.broadcast %cst_12 : f32 to vector<32x128xf32>
    %25 = arith.maximumf %23, %24 : vector<32x128xf32>
    %c0_13 = arith.constant 0 : index
    %c0_14 = arith.constant 0 : index
    %26 = vector.load %arg6[%c0_13, %c0_14] : memref<8x32xf32, #tpu.memory_space<vmem>>, vector<8x32xf32>
    %cst_15 = arith.constant dense<0.000000e+00> : vector<8x128xf32>
    %27 = tpu.matmul %26, %25, %cst_15 {dimension_numbers = #tpu.dot_dimension_numbers<[1], [0], [0], [1], [0, 0, 1, 1], [], []>} : vector<8x32xf32>, vector<32x128xf32>, vector<8x128xf32> -> vector<8x128xf32>
    %28 = vector.extract_strided_slice %27 {offsets = [0, 0], sizes = [1, 128], strides = [1, 1]} : vector<8x128xf32> to vector<1x128xf32>
    %29 = vector.extract_strided_slice %27 {offsets = [1, 0], sizes = [1, 128], strides = [1, 1]} : vector<8x128xf32> to vector<1x128xf32>
    %30 = vector.extract_strided_slice %27 {offsets = [2, 0], sizes = [1, 128], strides = [1, 1]} : vector<8x128xf32> to vector<1x128xf32>
    %31 = vector.extract_strided_slice %27 {offsets = [3, 0], sizes = [1, 128], strides = [1, 1]} : vector<8x128xf32> to vector<1x128xf32>
    %32 = arith.maximumf %28, %29 : vector<1x128xf32>
    %33 = arith.maximumf %32, %30 : vector<1x128xf32>
    %34 = arith.maximumf %33, %31 : vector<1x128xf32>
    %35 = arith.subf %28, %34 : vector<1x128xf32>
    %36 = math.exp %35 : vector<1x128xf32>
    %37 = arith.subf %29, %34 : vector<1x128xf32>
    %38 = math.exp %37 : vector<1x128xf32>
    %39 = arith.subf %30, %34 : vector<1x128xf32>
    %40 = math.exp %39 : vector<1x128xf32>
    %41 = arith.subf %31, %34 : vector<1x128xf32>
    %42 = math.exp %41 : vector<1x128xf32>
    %43 = arith.addf %36, %38 : vector<1x128xf32>
    %44 = arith.addf %43, %40 : vector<1x128xf32>
    %45 = arith.addf %44, %42 : vector<1x128xf32>
    %46 = tpu.reciprocal %45 : vector<1x128xf32> -> vector<1x128xf32>
    %47 = vector.extract_strided_slice %2 {offsets = [0, 0], sizes = [3, 1], strides = [1, 1]} : vector<3x4xf32> to vector<3x1xf32>
    %48 = vector.broadcast %47 : vector<3x1xf32> to vector<3x128xf32>
    %49 = vector.broadcast %36 : vector<1x128xf32> to vector<3x128xf32>
    %50 = arith.mulf %48, %49 : vector<3x128xf32>
    %51 = vector.extract_strided_slice %2 {offsets = [0, 1], sizes = [3, 1], strides = [1, 1]} : vector<3x4xf32> to vector<3x1xf32>
    %52 = vector.broadcast %51 : vector<3x1xf32> to vector<3x128xf32>
    %53 = vector.broadcast %38 : vector<1x128xf32> to vector<3x128xf32>
    %54 = arith.mulf %52, %53 : vector<3x128xf32>
    %55 = arith.addf %50, %54 : vector<3x128xf32>
    %56 = vector.extract_strided_slice %2 {offsets = [0, 2], sizes = [3, 1], strides = [1, 1]} : vector<3x4xf32> to vector<3x1xf32>
    %57 = vector.broadcast %56 : vector<3x1xf32> to vector<3x128xf32>
    %58 = vector.broadcast %40 : vector<1x128xf32> to vector<3x128xf32>
    %59 = arith.mulf %57, %58 : vector<3x128xf32>
    %60 = arith.addf %55, %59 : vector<3x128xf32>
    %61 = vector.extract_strided_slice %2 {offsets = [0, 3], sizes = [3, 1], strides = [1, 1]} : vector<3x4xf32> to vector<3x1xf32>
    %62 = vector.broadcast %61 : vector<3x1xf32> to vector<3x128xf32>
    %63 = vector.broadcast %42 : vector<1x128xf32> to vector<3x128xf32>
    %64 = arith.mulf %62, %63 : vector<3x128xf32>
    %65 = arith.addf %60, %64 : vector<3x128xf32>
    %66 = vector.broadcast %46 : vector<1x128xf32> to vector<3x128xf32>
    %67 = arith.mulf %65, %66 : vector<3x128xf32>
    %c0_16 = arith.constant 0 : index
    %c0_17 = arith.constant 0 : index
    %68 = vector.load %arg8[%c0_16, %c0_17] : memref<3x128xf32, #tpu.memory_space<vmem>>, vector<3x128xf32>
    tpu.vector_store %arg8[%c0_16, %c0_17], %67 {strides = array<i32>} : memref<3x128xf32, #tpu.memory_space<vmem>>, vector<3x128xf32>,
    return
  }
  func.func @transform_0(%arg0: i32) -> (i32, i32) {
    %c0_i32 = arith.constant 0 : i32
    %c0_i32_0 = arith.constant 0 : i32
    return %c0_i32, %arg0 : i32, i32
  }
  func.func @transform_1(%arg0: i32) -> (i32, i32) {
    %c0_i32 = arith.constant 0 : i32
    %c0_i32_0 = arith.constant 0 : i32
    %c0_i32_1 = arith.constant 0 : i32
    return %c0_i32, %c0_i32_0 : i32, i32
  }
  func.func @transform_2(%arg0: i32) -> (i32, i32) {
    %c0_i32 = arith.constant 0 : i32
    %c0_i32_0 = arith.constant 0 : i32
    %c0_i32_1 = arith.constant 0 : i32
    return %c0_i32, %c0_i32_0 : i32, i32
  }
  func.func @transform_3(%arg0: i32) -> (i32, i32) {
    %c0_i32 = arith.constant 0 : i32
    %c0_i32_0 = arith.constant 0 : i32
    %c0_i32_1 = arith.constant 0 : i32
    return %c0_i32, %c0_i32_0 : i32, i32
  }
  func.func @transform_4(%arg0: i32) -> (i32, i32) {
    %c0_i32 = arith.constant 0 : i32
    %c0_i32_0 = arith.constant 0 : i32
    %c0_i32_1 = arith.constant 0 : i32
    return %c0_i32, %c0_i32_0 : i32, i32
  }
  func.func @transform_5(%arg0: i32) -> (i32, i32) {
    %c0_i32 = arith.constant 0 : i32
    %c0_i32_0 = arith.constant 0 : i32
    %c0_i32_1 = arith.constant 0 : i32
    return %c0_i32, %c0_i32_0 : i32, i32
  }
  func.func @transform_6(%arg0: i32) -> (i32, i32) {
    %c0_i32 = arith.constant 0 : i32
    %c0_i32_0 = arith.constant 0 : i32
    %c0_i32_1 = arith.constant 0 : i32
    return %c0_i32, %c0_i32_0 : i32, i32
  }
  func.func @transform_7(%arg0: i32) -> (i32, i32) {
    %c0_i32 = arith.constant 0 : i32
    %c0_i32_0 = arith.constant 0 : i32
    return %c0_i32, %arg0 : i32, i32
  }
}

</mosaic_0001>

<bundles_post_ra>
// kernel: tpu_custom_call.1
= control target key start
LH: loop header
LB: loop body
LE: loop exit
PB: predicated region body
PF: predicated region fallthrough
CT: control target
= control target key end

     0   :  { %12 = vsyncpa [#allocation3], 0  ;;  %s1158_s0 = inlined_call_operand.vmem [shape: f32[2,256], index: 0, kind: input, shape index: {}]   ;;  %s1159_s1 = inlined_call_operand.vmem [shape: f32[32,2], index: 1, kind: input, shape index: {}]   ;;  %s1160_s2 = inlined_call_operand.vmem [shape: f32[32,1], index: 2, kind: input, shape index: {}]   ;;  %s1161_s3 = inlined_call_operand.vmem [shape: f32[32,32], index: 3, kind: input, shape index: {}]   ;;  %s1162_s4 = inlined_call_operand.vmem [shape: f32[32,1], index: 4, kind: input, shape index: {}]   ;;  %s1163_s5 = inlined_call_operand.vmem [shape: f32[8,32], index: 5, kind: input, shape index: {}]   ;;  %s1164_s6 = inlined_call_operand.vmem [shape: f32[3,4], index: 6, kind: input, shape index: {}]   ;;  %s1165_s7 = inlined_call_operand.hbm [shape: f32[3,256], index: 7, kind: output, shape index: {}]  }
   0x1   :  { %14 = vsyncpa [#allocation3 + $0x1], 0  ;;  %s978_s24 = smov 0   ;;  %s980_s25 = smov 0  }
   0x2   :  { %s982_s26 = smov 0   ;;  %s984_s27 = smov 0  }
   0x3 LB: > { %s999_s28 = sadd.s32 4294967295, %s928_s27   ;;  %s733_s29 = sadd.s32 4294967294, %s928_s27   ;;  %s928_s27 = sphi %s984_s27, %s1171_s27   ;;  %s924_s26 = sphi %s982_s26, %s1170_s26   ;;  %s920_s25 = sphi %s980_s25, %s1169_s25   ;;  %s916_s24 = sphi %s978_s24, %s1168_s24  }
   0x4   : > { %s1003_s30 = sadd.s32 1, %s928_s27   ;;  %s179_s8 = sadd.s32 1, %s924_s26 }
   0x5   : > { %s176_s9 = ssub.s32 %s928_s27, %s1003_s30  ;;  %p189_p0 = scmp.ne.s32.totalorder %s924_s26, %s920_s25 }
   0x6   : > { %p177_p1 = scmp.eq.s32.totalorder %s176_s9, 0  ;;  %p190_p2 = scmp.eq.s32.totalorder %s999_s28, 1 }
   0x7   : > { %p195_p3 = scmp.ne.s32.totalorder %s920_s25, %s916_s24  ;;  %p196_p4 = scmp.eq.s32.totalorder %s733_s29, 1 }
   0x8   : > { %s1014_s10 = scalar_select %p177_p1, %s924_s26, %s179_s8  }
   0x9   : > { %p1016_p5 = por %p190_p2, %p189_p0  ;;  %p1020_p6 = por %p196_p4, %p195_p3 }
   0xa   : > { %p736_p7 = scmp.ge.s32.totalorder %s928_s27, 1  ;;  %p239_p8 = scmp.lt.s32.totalorder %s928_s27, 3 }
   0xc   : > { %p240_p9 = pnand %p736_p7, %p239_p8 }
   0xd   : > { %v277_v0 = vld [vmem:[%s1159_s1 + $0x10] sm:$0xff] (!%p240_p9)  ;;  %v275_v1 = vld [vmem:[%s1159_s1] sm:$0xff] (!%p240_p9)  ;;  %v930_v2 = vmov (!%p240_p9), 1   ;;  %v276_v3 = vld [vmem:[%s1159_s1 + $0x8] sm:$0xff] (!%p240_p9)  ;;  %v931_v4 = vmov (!%p240_p9), 0   ;;  %vm396_vm0 = vcmask (!%p240_p9), 261120   ;;  %v300_v16 = vlaneseq (!%p240_p9) }
   0xe   : > { %243 = sbr.rel (%p240_p9) target bundleno = 680 (0x2a8), region = 48  ;;  %848 = vset.pattern.permute.xlu0 (!%p240_p9), %v930_v2  ;;  %846 = vset.pattern.permute.xlu1 (!%p240_p9), %v930_v2  ;;  %v278_v5 = vld [vmem:[%s1159_s1 + $0x18] sm:$0xff] (!%p240_p9)  ;;  %v337_v6 = vld [vmem:[%s1160_s2 + $0x8] sm:$0xff] (!%p240_p9)  ;;  %v336_v7 = vld [vmem:[%s1160_s2] sm:$0xff] (!%p240_p9)  ;;  %p270_p10 = scmp.lt.s32.totalorder (!%p240_p9), %s999_s28, 1  ;;  %v932_v60 = vmov (!%p240_p9), 0.0|0.0  }
   0xf   : > { %317 = vperm.xlu0 (!%p240_p9), %848, %v277_v0   ;;  %309 = vperm.xlu1 (!%p240_p9), %846, %v275_v1   ;;  %v372_v8 = vld [vmem:[%s1162_s4] sm:$0xff] (!%p240_p9)  ;;  %v338_v9 = vld [vmem:[%s1160_s2 + $0x10] sm:$0xff] (!%p240_p9)  ;;  %v339_v11 = vld [vmem:[%s1160_s2 + $0x18] sm:$0xff] (!%p240_p9)  ;;  %v1075_v19 = vshrl.u32 (!%p240_p9), %v300_v16, 7  ;;  %vm933_vm1 = vmmov (!%p240_p9), 0   ;;  %v934_v61 = vmov (!%p240_p9), 0.0  }
  0x10   : > { %v374_v10 = vld [vmem:[%s1162_s4 + $0x10] sm:$0xff] (!%p240_p9)  ;;  %v1059_v12 = vld [vmem:[%s1164_s6] sm:$0x7] (!%p240_p9)  ;;  %v373_v13 = vld [vmem:[%s1162_s4 + $0x8] sm:$0xff] (!%p240_p9)  ;;  %794 = vmatprep.subr.bf16.mxu1 (!%p240_p9), %v932_v60  ;;  %783 = vmatprep.mubr.msk.f32.mxu1 (!%p240_p9), %vm933_vm1, %v934_v61  ;;  %v935_v62 = vmov (!%p240_p9), 2   ;;  %v936_v63 = vmov (!%p240_p9), 3  }
  0x11   : > { %v375_v14 = vld [vmem:[%s1162_s4 + $0x18] sm:$0xff] (!%p240_p9)  ;;  %v368_v15 = vld [vmem:[%s1161_s3] sm:$0xff] (!%p240_p9)  ;;  %v1081_v22 = vsub.s32 (!%p240_p9), 0, %v1075_v19  ;;  %v326_v23 = vsub.s32 (!%p240_p9), 1, %v1075_v19  ;;  %v369_v57 = vld [vmem:[%s1161_s3 + $0x8] sm:$0xff] (!%p240_p9)  ;;  %s267_s9 = sand.u32 (!%p240_p9), 1, %s920_s25  }
  0x12   : > { %769 = vmatprep.mubr.msk.f32.mxu0 (!%p240_p9), %vm396_vm0, %v368_v15  ;;  %v370_v58 = vld [vmem:[%s1161_s3 + $0x10] sm:$0xff] (!%p240_p9)  ;;  %v371_v59 = vld [vmem:[%s1161_s3 + $0x18] sm:$0xff] (!%p240_p9)  ;;  %s661_s20 = scalar_lea.sflag (!%p240_p9), [#allocation3], %s267_s9 }
  0x13   : > { %849 = vset.pattern.permute.xlu0 (!%p240_p9), %v931_v4  ;;  %313 = vperm.xlu1 (!%p240_p9), %846, %v276_v3  }
  0x14   : > { %282 = vperm.xlu0 (!%p240_p9), %849, %v275_v1  }
  0x15   : > { %s271_s13 = scalar_select %p270_p10, %s999_s28, 1 }
  0x17   : > { %847 = vset.pattern.permute.xlu1 %v931_v4  ;;  %s738_s14 = sshll.u32 %s271_s13, 1  ;;  %s737_s13 = sshll.u32 %s267_s9, 2 }
  0x18   : > { %287 = vperm.xlu0 %849, %v276_v3   ;;  %297 = vperm.xlu1 %847, %v278_v5   ;;  %s273_s17 = scalar_lea.vmem %s1158_s0, %s738_s14  ;;  %s745_s14 = sshll.u32 %s999_s28, 6 }
  0x19   : > { %v274_v24 = vld [vmem:[%s273_s17] sm:$0x3]  ;;  %s269_s15 = scalar_lea.vmem [#allocation2], %s737_s13  ;;  %s1116_s19 = scalar_lea.hbm %s1165_s7, %s745_s14 }
  0x1a   : > { %v303_v27 = vrot.slane %v274_v24, %v1081_v22  ;;  %v327_v28 = vrot.slane %v274_v24, %v326_v23  ;;  %s674_s16 = sshll.u32 %s269_s15, 4  ;;  %s937_s28 = smov [#allocation2]   ;;  %s1118_s16 = int_to_ptr.vmem [resolvable:$true] %s674_s16 }
  0x1b   : > { %s866_s21 = scalar_lea.vmem %s1118_s16, 64  ;;  %s870_s22 = sshll.u32 %s937_s28, 4  ;;  %s871_s22 = int_to_ptr.vmem [resolvable:$false] %s870_s22 }
  0x1c   : > { %292 = vperm.xlu0 %849, %v277_v0   ;;  %850 = vset.pattern.permute.xlu1 %v930_v2  ;;  %p867_p11 = scmp.ne.s32.totalorder %s1118_s16, %s866_s21  ;;  %s872_s23 = scalar_lea.vmem %s871_s22, 128 }
  0x1d   : > { %321 = vperm.xlu1 %850, %v278_v5   ;;  %p873_p0 = scmp.lt.s32.totalorder %s1118_s16, %s871_s22  ;;  %p874_p1 = scmp.lt.s32.totalorder %s872_s23, %s866_s21 }
  0x1e   : > { %p868_p12 = pnand %p867_p11, %p1016_p5 }
  0x1f   : > { %p875_p2 = por %p874_p1, %p873_p0 }
  0x20   : > { %347 = vperm.xlu0 %849, %v337_v6   ;;  %p869_p13 = pneg %p868_p12 }
  0x21   : > { %851 = vset.pattern.permute.xlu1 %v931_v4 }
  0x22   : > { %342 = vperm.xlu1 %851, %v336_v7   ;;  %p876_p3 = pnand %p875_p2, %p869_p13 }
  0x24   : > { %378 = vperm.xlu0 %849, %v372_v8  }
  0x26   : > { %352 = vperm.xlu1 %851, %v338_v9  }
  0x28   : > { %388 = vperm.xlu0 %849, %v374_v10  }
  0x2a   : > { %357 = vperm.xlu1 %851, %v339_v11  }
  0x2c   : > { %616 = vperm.xlu0 %849, %v1059_v12  }
  0x2e   : > { %383 = vperm.xlu1 %851, %v373_v13  }
  0x30   : > { %853 = vset.pattern.permute.xlu0 %v935_v62 }
  0x31   : > { %635 = vperm.xlu0 %853, %v1059_v12  }
  0x32   : > { %393 = vperm.xlu1 %851, %v375_v14  }
  0x35   : > { %855 = vset.pattern.permute.xlu0 %v936_v63 }
  0x36   : > { %852 = vset.pattern.permute.xlu1 %v930_v2 }
  0x37   : > { %625 = vperm.xlu1 %852, %v1059_v12  }
  0x3b   : > { %854 = vset.pattern.permute.xlu1 %v936_v63 }
  0x3c   : > { %645 = vperm.xlu1 %854, %v1059_v12  }
  0x8e   : > { %v310_v17 = vpop.permute.xlu1 %309  ;;  %v318_v18 = vpop.permute.xlu0 %317 }
  0x8f   : > { %v328_v34 = vmul.f32 %v327_v28, %v310_v17  ;;  %v330_v42 = vmul.f32 %v327_v28, %v318_v18  ;;  %v498_v18 = vld [vmem:[%s1163_s5] sm:$0xff] }
  0x92   : > { %v314_v20 = vpop.permute.xlu1 %313 }
  0x93   : > { %v283_v21 = vpop.permute.xlu0 %282  ;;  %v329_v31 = vmul.f32 %v327_v28, %v314_v20 }
  0x94   : > { %v304_v32 = vmul.f32 %v303_v27, %v283_v21 }
  0x96   : > { %v332_v38 = vadd.f32 %v328_v34, %v304_v32 }
  0x97   : > { %v288_v25 = vpop.permute.xlu0 %287  ;;  %v298_v26 = vpop.permute.xlu1 %297 }
  0x98   : > { %v305_v29 = vmul.f32 %v303_v27, %v288_v25  ;;  %v307_v47 = vmul.f32 %v303_v27, %v298_v26 }
  0x9a   : > { %v333_v35 = vadd.f32 %v329_v31, %v305_v29 }
  0x9b   : > { %v293_v30 = vpop.permute.xlu0 %292 }
  0x9c   : > { %v322_v33 = vpop.permute.xlu1 %321  ;;  %v306_v40 = vmul.f32 %v303_v27, %v293_v30 }
  0x9d   : > { %v331_v43 = vmul.f32 %v327_v28, %v322_v33 }
  0x9e   : > { %v334_v48 = vadd.f32 %v330_v42, %v306_v40 }
  0x9f   : > { %v348_v36 = vpop.permute.xlu0 %347  ;;  %v335_v51 = vadd.f32 %v331_v43, %v307_v47 }
  0xa0   : > { %v361_v37 = vadd.f32 %v348_v36, %v333_v35 }
  0xa1   : > { %v343_v39 = vpop.permute.xlu1 %342 }
  0xa2   : > { %v360_v41 = vadd.f32 %v343_v39, %v332_v38  ;;  %v365_v44 = vmax.f32 %v361_v37, 0.0 }
  0xa3   : > { %v379_v1 = vpop.permute.xlu0 %378 }
  0xa4   : > { %v364_v45 = vmax.f32 %v360_v41, 0.0 }
  0xa5   : > { %v353_v46 = vpop.permute.xlu1 %352 }
  0xa6   : > { %v786_v49 = vpack.c.bf16 %v365_v44, %v364_v45  ;;  %v362_v50 = vadd.f32 %v353_v46, %v334_v48 }
  0xa7   : > { %v389_v10 = vpop.permute.xlu0 %388 }
  0xa8   : > { %787 = vmatprep.subr.bf16.mxu0 %v786_v49  ;;  %v366_v54 = vmax.f32 %v362_v50, 0.0 }
  0xa9   : > { %v358_v52 = vpop.permute.xlu1 %357  ;;  %789 = vmatpush3.bf16.msra.mxu0 %v786_v49 }
  0xaa   : > { %v363_v53 = vadd.f32 %v358_v52, %v335_v51  ;;  %v640_v52 = vsub.s32 2, %v1075_v19 }
  0xac   : > { %v367_v55 = vmax.f32 %v363_v53, 0.0  ;;  %v617_v53 = vpop.permute.xlu0 %616 }
  0xad   : > { %v384_v0 = vpop.permute.xlu1 %383 }
  0xae   : > { %v790_v56 = vpack.c.bf16 %v367_v55, %v366_v54 }
  0xb0   : > { %791 = vmatprep.subr.bf16.mxu0 %v790_v56 }
  0xb1   : > { %793 = vmatpush3.bf16.msra.mxu0 %v790_v56  ;;  %v394_v7 = vpop.permute.xlu1 %393 }
  0xb4   : > { %770 = vmatmul.mubr.msk.f32.vlgmr.msra.gmra.mrb[0].mxu0 %vm396_vm0, %v369_v57 }
  0xb5   : > { %772 = vmatprep.mubr.msk.f32.mxu0 %vm396_vm0, %v370_v58 }
  0xb6   : > { %v626_v54 = vpop.permute.xlu1 %625 }
  0xb8   : > { %773 = vmatmul.mubr.msk.f32.gmra.mrb[2].mxu0 %vm396_vm0, %v371_v59  ;;  %v650_v59 = vsub.s32 3, %v1075_v19 }
  0xbb   : > { %v646_v63 = vpop.permute.xlu1 %645 }
 0x187   : > { %v771_v2 = vpop.f32.mrb[0].mxu0 }
 0x188   : > { %v481_v3 = vadd.f32 %v771_v2, %v384_v0  ;;  %v475_v4 = vpop.f32.mrb[1].mxu0 }
 0x189   : > { %v476_v5 = vadd.f32 %v475_v4, %v379_v1 }
 0x18a   : > { %v495_v6 = vmax.f32 %v481_v3, 0.0 }
 0x18b   : > { %v494_v8 = vmax.f32 %v476_v5, 0.0  ;;  %v774_v9 = vpop.f32.mrb[2].mxu0 }
 0x18c   : > { %v491_v11 = vadd.f32 %v774_v9, %v394_v7  ;;  %v485_v13 = vpop.f32.mrb[3].mxu0 }
 0x18d   : > { %v486_v14 = vadd.f32 %v485_v13, %v389_v10  ;;  %v795_v15 = vpack.c.bf16 %v495_v6, %v494_v8 }
 0x18e   : > { %v497_v16 = vmax.f32 %v491_v11, 0.0 }
 0x18f   : > { %v496_v17 = vmax.f32 %v486_v14, 0.0  ;;  %796 = vmatpush3.bf16.msra.mxu1 %v795_v15 }
 0x190   : > { %797 = vmatprep.subr.bf16.mxu1 %v932_v60  ;;  %v636_v60 = vpop.permute.xlu0 %635 }
 0x191   : > { %v798_v12 = vpack.c.bf16 %v497_v16, %v496_v17 }
 0x193   : > { %799 = vmatpush3.bf16.msra.mxu1 %v798_v12 }
 0x196   : > { %784 = vmatmul.mubr.msk.f32.vlgmr.msra.gmra.mrb[0].mxu1 %vm396_vm0, %v498_v18 }
 0x269   : > { %v568_v20 = vpop.f32.mrb[0].mxu1 }
 0x26a   : > { %v573_v21 = vrot.slane %v568_v20, 1  ;;  %v785_v24 = vpop.f32.mrb[1].mxu1  ;;  %v576_v26 = vrot.slane %v568_v20, 2  ;;  %v579_v28 = vrot.slane %v568_v20, 3 }
 0x26c   : > { %v575_v25 = vmax.f32 %v568_v20, %v573_v21 }
 0x26e   : > { %v578_v27 = vmax.f32 %v575_v25, %v576_v26 }
 0x270   : > { %v581_v29 = vmax.f32 %v578_v27, %v579_v28 }
 0x272   : > { %v582_v30 = vsub.f32 %v568_v20, %v581_v29  ;;  %v586_v31 = vrot.slane %v581_v29, 7  ;;  %v591_v32 = vrot.slane %v581_v29, 6  ;;  %v596_v33 = vrot.slane %v581_v29, 5 }
 0x274   : > { %v583_v34 = vmul.f32 1.442695, %v582_v30  ;;  %v588_v35 = vsub.f32 %v568_v20, %v586_v31  ;;  %v593_v36 = vsub.f32 %v568_v20, %v591_v32  ;;  %v598_v37 = vsub.f32 %v568_v20, %v596_v33 }
 0x276   : > { %v589_v38 = vmul.f32 1.442695, %v588_v35  ;;  %v594_v39 = vmul.f32 1.442695, %v593_v36  ;;  %v599_v40 = vmul.f32 1.442695, %v598_v37  ;;  %856 = vpow2.f32 %v583_v34 }
 0x278   : > { %858 = vpow2.f32 %v589_v38 }
 0x279   : > { %860 = vpow2.f32 %v594_v39 }
 0x27a   : > { %862 = vpow2.f32 %v599_v40 }
 0x280   : > { %v857_v41 = vpop.eup %856 }
 0x281   : > { %v622_v51 = vrot.slane %v857_v41, %v1081_v22 }
 0x282   : > { %v859_v42 = vpop.eup %858 }
 0x283   : > { %v861_v43 = vpop.eup %860  ;;  %v602_v44 = vrot.slane %v859_v42, 1  ;;  %v631_v48 = vrot.slane %v859_v42, %v326_v23  ;;  %v623_v57 = vmul.f32 %v622_v51, %v617_v53 }
 0x284   : > { %v863_v45 = vpop.eup %862  ;;  %v606_v47 = vrot.slane %v861_v43, 2  ;;  %v641_v58 = vrot.slane %v861_v43, %v640_v52 }
 0x285   : > { %v604_v46 = vadd.f32 %v857_v41, %v602_v44  ;;  %v610_v50 = vrot.slane %v863_v45, 3  ;;  %v632_v56 = vmul.f32 %v631_v48, %v626_v54  ;;  %v651_v62 = vrot.slane %v863_v45, %v650_v59 }
 0x286   : > { %v642_v23 = vmul.f32 %v641_v58, %v636_v60 }
 0x287   : > { %v608_v49 = vadd.f32 %v606_v47, %v604_v46  ;;  %v633_v61 = vadd.f32 %v632_v56, %v623_v57  ;;  %v652_v1 = vmul.f32 %v651_v62, %v646_v63 }
 0x289   : > { %v612_v55 = vadd.f32 %v610_v50, %v608_v49  ;;  %v643_v0 = vadd.f32 %v642_v23, %v633_v61 }
 0x28b   : > { %864 = vrcp.f32 %v612_v55  ;;  %v653_v3 = vadd.f32 %v652_v1, %v643_v0 }
 0x295   : > { %v865_v2 = vpop.eup %864 }
 0x296   : > { %v657_v4 = vrot.slane %v865_v2, %v1081_v22 }
 0x298   : > { %v658_v5 = vmul.f32 %v657_v4, %v653_v3 }
 0x29a   : > { %659 = vst [vmem:[%s269_s15] sm:$0x7] %v658_v5 }
 0x29b   : > { %879 = shalt.err (!%p876_p3)
}
 0x29c   : > { %s880_s29 = scalar_lea.hbm %s1116_s19, 64  ;;  %s884_s13 = scalar_lea.hbm %s1165_s7, 128 }
 0x29d   : > { %p881_p4 = scmp.ne.s32.totalorder %s1116_s19, %s880_s29  ;;  %p885_p9 = scmp.lt.u32.totalorder %s1116_s19, %s1165_s7 }
 0x29e   : > { %p886_p10 = scmp.lt.u32.totalorder %s884_s13, %s880_s29  ;;  %p888_p12 = scmp.lt.u32.totalorder %s880_s29, %s1116_s19 }
 0x29f   : > { %p882_p7 = pnand %p881_p4, %p1016_p5 }
 0x2a0   : > { %p887_p11 = por %p886_p10, %p885_p9 }
 0x2a1   : > { %p883_p8 = pneg %p882_p7 }
 0x2a2   : > { %p889_p13 = por %p888_p12, %p887_p11 }
 0x2a4   : > { %p890_p0 = pnand %p889_p13, %p883_p8 }
 0x2a6   : > { %893 = shalt.err (!%p890_p0)
}
 0x2a7   : > { %800 = dma.vmem_to_hbm [thread:$0]  (%p1016_p5), %s1118_s16, 64, %s1116_s19, %s661_s20  }
 0x2a8 PF: > { %p806_p1 = scmp.ge.s32.totalorder %s928_s27, 2  ;;  %s686_s17 = sand.u32 1, %s916_s24  }
 0x2a9   : > { %s687_s18 = scalar_lea.sflag [#allocation3], %s686_s17 }
 0x2aa   : > { %p803_p2 = pnand %p806_p1, %p1020_p6 }
 0x2ac   : > { %911 = dma.done.wait (!%p803_p2), %s687_s18, 64  }
 0x2ad   : > { %913 = vsyncadd (!%p803_p2), %s687_s18, 4294967232  ;;  %p17_p3 = scmp.ge.s32.totalorder %s1003_s30, 4   ;;  %s1168_s24 = smov %s920_s25 }
 0x2ae   : > { %s1169_s25 = smov %s924_s26  ;;  %s1170_s26 = smov %s1014_s10 }
 0x2af   : > { %s1171_s27 = smov %s1003_s30  ;;  %19 = sbr.rel (!%p17_p3) target bundleno = 3 (0x3), region = 83 }
 0x2b6   :  { %692 = vsyncpa [#allocation3], 1 }
 0x2b7   :  { %694 = vsyncpa [#allocation3 + $0x1], 1 }

</bundles_post_ra>
